<compile_context>
chip_gen: v5e
topology: v5e:2x2
jax: 0.10.0
libtpu: 0.0.40
codegen_flags: <defaults>
</compile_context>

<pallas_src>
import jax
import jax.numpy as jnp
from jax import lax
from jax.experimental import pallas as pl
from jax.experimental.pallas import tpu as pltpu

_SUBLANE = 8
_LANE = 128


def _round_up(x: int, m: int) -> int:
    return ((x + m - 1) // m) * m


def edema_head_kernel(x_ref, w_ref, b_ref, o_ref):
    """One batch tile of the CLS-token linear head.

    x_ref: (tb, E)  CLS rows for this batch tile
    w_ref: (C, E)   weight (PyTorch nn.Linear layout), resident in VMEM
    b_ref: (C, 1)   bias column, resident in VMEM
    o_ref: (C, tb)  output tile -- batch in the lane dim => lane-dense stores
    """
    # out[c, t] = sum_e w[c, e] * x[t, e]  -> (C, tb) on the MXU, f32 accum.
    y = lax.dot_general(
        w_ref[...], x_ref[...],
        dimension_numbers=(((1,), (1,)), ((), ())),
        preferred_element_type=jnp.float32,
    )
    # Bias add in f32, single downcast at the store (correct on v5e, which has
    # no bf16 VPU path; free everywhere else).
    o_ref[...] = (y + b_ref[...]).astype(o_ref.dtype)


def edema_head(x, w, b, *, tb: int = 8192,
               vmem_budget_bytes: int = 48 * 1024 * 1024):
    """CLS-token linear head: returns x[:, 0] @ w.T + b with shape (B, C).

    x: (B, S, E) or (B, E) activations (f32 or bf16).
    w: (C, E) weight (PyTorch nn.Linear layout).   b: (C,) bias.
    tb: requested batch tile (rows per grid step).  The op is mem-bound, so
        bigger tiles amortize the ~0.35 us per-step overhead; the wrapper
        rounds/caps it, shrinks it to the VMEM budget, and guarantees >=2 grid
        steps for v7x megacore when B is large enough.
    vmem_budget_bytes: scoped-VMEM budget (also passed as vmem_limit_bytes).
        48 MiB default: above v5e's 16 MiB scoped default, below v7x's
        64 MiB physical.
    """
    w = jnp.asarray(w)
    b = jnp.asarray(b)
    C, E = w.shape
    B = x.shape[0]
    itemsize = x.dtype.itemsize

    # ---- Present only the CLS rows to the kernel --------------------------
    if x.ndim == 3:
        S = x.shape[1]
        assert x.shape[2] == E, (x.shape, w.shape)
        if E % _LANE == 0 and E * itemsize >= 512:
            # Zero-copy collapse of trailing dims: the (tb, E) window over
            # (B, S*E) reads exactly the CLS bytes (strided DMA, stride S*E).
            x_in = x.reshape(B, S * E)
        else:
            # Chunks would be <512 B strided reads (descriptor-overhead-bound);
            # let XLA pre-slice the CLS rows into a contiguous (B, E) array.
            x_in = x[:, 0]
    elif x.ndim == 2:
        assert x.shape[1] == E, (x.shape, w.shape)
        x_in = x
    else:
        raise ValueError(f"expected (B, S, E) or (B, E) input, got {x.shape}")

    b_col = b.reshape(C, 1)

    # ---- Batch tile selection ---------------------------------------------
    tb_sel = max(1, min(int(tb), B))
    if tb_sel < B:
        # Lane dim of the (C, tb) output block must be a multiple of 128 when
        # the tile does not cover the whole batch (sublane dim of x likewise).
        tb_sel = max(_LANE, (tb_sel // _LANE) * _LANE)
        if tb_sel > B:
            tb_sel = B
    elif B >= 2 * _LANE:
        # >= 2 grid steps so the "parallel" axis can shard the CLS-row DMA
        # stream across both TensorCores on v7x.
        tb_sel = min(B, _round_up(pl.cdiv(B, 2), _LANE))

    # Shrink to the VMEM budget: x is double-buffered; the (C, tb) out block
    # pads C to 8 sublanes; count the resident weight/bias buffers too.
    pad_c = _round_up(C, _SUBLANE)

    def _vmem_need(t: int) -> int:
        x_buf = 2 * t * E * itemsize
        o_buf = 2 * pad_c * _round_up(t, _LANE) * itemsize
        w_buf = 2 * pad_c * _round_up(E, _LANE) * w.dtype.itemsize
        b_buf = 2 * pad_c * _LANE * b.dtype.itemsize
        return x_buf + o_buf + w_buf + b_buf

    while tb_sel > _LANE and _vmem_need(tb_sel) > vmem_budget_bytes:
        tb_sel = max(_LANE, ((tb_sel // 2) // _LANE) * _LANE)

    grid = (pl.cdiv(B, tb_sel),)

    cost = pl.CostEstimate(
        flops=2 * B * E * C,
        transcendentals=0,
        bytes_accessed=int((B * E + B * C) * itemsize
                           + (C * E + C) * w.dtype.itemsize),
    )

    out_cb = pl.pallas_call(
        edema_head_kernel,
        out_shape=jax.ShapeDtypeStruct((C, B), x.dtype),
        grid=grid,
        in_specs=[
            # CLS rows for this batch tile: (tb, E) window, feature-block 0 so
            # only the leading E lanes (the CLS token after the reshape) are
            # streamed from HBM.
            pl.BlockSpec((tb_sel, E), lambda i: (i, 0)),
            # Weight / bias: constant index_map -> stay resident in VMEM.
            pl.BlockSpec((C, E), lambda i: (0, 0)),
            pl.BlockSpec((C, 1), lambda i: (0, 0)),
        ],
        # Batch in the lane dim: no 64x C-padding in VMEM, lane-dense stores.
        out_specs=pl.BlockSpec((C, tb_sel), lambda i: (0, i)),
        compiler_params=pltpu.CompilerParams(
            # Independent batch tiles -> megacore-shardable on v7x.
            dimension_semantics=("parallel",),
            vmem_limit_bytes=int(vmem_budget_bytes),
        ),
        cost_estimate=cost,
    )(x_in, w, b_col)

    # Tiny (C, B) -> (B, C) transpose in the wrapper (B*C elements, negligible
    # next to the B*E-byte input stream).
    return out_cb.T


def init_params(key, emb_size, classes):
    # nn.Linear default init: U(-1/sqrt(E), 1/sqrt(E)); PyTorch layout
    # weight (C, E), bias (C,).
    kw, kb = jax.random.split(key)
    bound = 1.0 / (emb_size ** 0.5)
    w = jax.random.uniform(kw, (classes, emb_size), jnp.float32, -bound, bound)
    b = jax.random.uniform(kb, (classes,), jnp.float32, -bound, bound)
    return w, b


if __name__ == "__main__":
    key = jax.random.PRNGKey(0)
    kx, kp, kx2, kp2 = jax.random.split(key, 4)

    # --- Required small demo: (batch=2, seq=8, emb=32, classes=2). ---------
    # E=32 < 128 -> the wrapper pre-slices x[:, 0] contiguously (tiny shapes;
    # in production this size would be left to plain XLA anyway).
    B, S, E, C = 2, 8, 32, 2
    x = jax.random.normal(kx, (B, S, E), jnp.float32)
    w, b = init_params(kp, E, C)

    out = jax.block_until_ready(edema_head(x, w, b))
    ref = jnp.dot(x[:, 0], w.T, precision=lax.Precision.HIGHEST) + b
    assert out.shape == (B, C)
    assert jnp.allclose(out, ref, atol=2e-2, rtol=2e-2)

    # --- Second check at the module's default emb_size=256: exercises the ---
    # zero-copy CLS strided-DMA path, a multi-step grid (2 tiles for v7x
    # megacore) and a partial last batch tile.
    B2, S2, E2 = 384, 4, 256
    x2 = jax.random.normal(kx2, (B2, S2, E2), jnp.float32)
    w2, b2 = init_params(kp2, E2, C)

    out2 = jax.block_until_ready(edema_head(x2, w2, b2))
    ref2 = jnp.dot(x2[:, 0], w2.T, precision=lax.Precision.HIGHEST) + b2
    assert out2.shape == (B2, C)
    assert jnp.allclose(out2, ref2, atol=2e-2, rtol=2e-2)

    print("KERNEL_OK")
</pallas_src>

<mosaic_0001>
module attributes {stable_mosaic.version = 11 : i64} {
  func.func @edema_head_kernel(%arg0: i32, %arg1: memref<2x32xf32, #tpu.memory_space<vmem>>, %arg2: memref<2x32xf32, #tpu.memory_space<vmem>>, %arg3: memref<2x1xf32, #tpu.memory_space<vmem>>, %arg4: memref<2x2xf32, #tpu.memory_space<vmem>>) attributes {dimension_semantics = [#tpu.dimension_semantics<parallel>], iteration_bounds = array<i64: 1>, scalar_prefetch = 0 : i64, scratch_operands = 0 : i64, tpu.core_type = #tpu.core_type<tc>, window_params = [{transform_indices = @transform_0, window_bounds = array<i64: 2, 32>}, {pipeline_mode = #tpu.pipeline_mode<synchronous>, transform_indices = @transform_1, window_bounds = array<i64: 2, 32>}, {pipeline_mode = #tpu.pipeline_mode<synchronous>, transform_indices = @transform_2, window_bounds = array<i64: 2, 1>}, {transform_indices = @transform_3, window_bounds = array<i64: 2, 2>}]} {
    %c0 = arith.constant 0 : index
    %c0_0 = arith.constant 0 : index
    %0 = vector.load %arg2[%c0, %c0_0] : memref<2x32xf32, #tpu.memory_space<vmem>>, vector<2x32xf32>
    %c0_1 = arith.constant 0 : index
    %c0_2 = arith.constant 0 : index
    %1 = vector.load %arg1[%c0_1, %c0_2] : memref<2x32xf32, #tpu.memory_space<vmem>>, vector<2x32xf32>
    %cst = arith.constant dense<0.000000e+00> : vector<2x2xf32>
    %2 = tpu.matmul %0, %1, %cst {dimension_numbers = #tpu.dot_dimension_numbers<[1], [1], [0], [0], [0, 0, 1, 0], [], []>} : vector<2x32xf32>, vector<2x32xf32>, vector<2x2xf32> -> vector<2x2xf32>
    %c0_3 = arith.constant 0 : index
    %c0_4 = arith.constant 0 : index
    %3 = vector.load %arg3[%c0_3, %c0_4] : memref<2x1xf32, #tpu.memory_space<vmem>>, vector<2x1xf32>
    %4 = vector.broadcast %3 : vector<2x1xf32> to vector<2x2xf32>
    %5 = arith.addf %2, %4 : vector<2x2xf32>
    %c0_5 = arith.constant 0 : index
    %c0_6 = arith.constant 0 : index
    %6 = vector.load %arg4[%c0_5, %c0_6] : memref<2x2xf32, #tpu.memory_space<vmem>>, vector<2x2xf32>
    tpu.vector_store %arg4[%c0_5, %c0_6], %5 {strides = array<i32>} : memref<2x2xf32, #tpu.memory_space<vmem>>, vector<2x2xf32>,
    return
  }
  func.func @transform_0(%arg0: i32) -> (i32, i32) {
    %c0_i32 = arith.constant 0 : i32
    %c0_i32_0 = arith.constant 0 : i32
    return %arg0, %c0_i32 : i32, i32
  }
  func.func @transform_1(%arg0: i32) -> (i32, i32) {
    %c0_i32 = arith.constant 0 : i32
    %c0_i32_0 = arith.constant 0 : i32
    %c0_i32_1 = arith.constant 0 : i32
    return %c0_i32, %c0_i32_0 : i32, i32
  }
  func.func @transform_2(%arg0: i32) -> (i32, i32) {
    %c0_i32 = arith.constant 0 : i32
    %c0_i32_0 = arith.constant 0 : i32
    %c0_i32_1 = arith.constant 0 : i32
    return %c0_i32, %c0_i32_0 : i32, i32
  }
  func.func @transform_3(%arg0: i32) -> (i32, i32) {
    %c0_i32 = arith.constant 0 : i32
    %c0_i32_0 = arith.constant 0 : i32
    return %c0_i32, %arg0 : i32, i32
  }
}

</mosaic_0001>

<bundles_post_ra>
// kernel: tpu_custom_call.1
= control target key start
LH: loop header
LB: loop body
LE: loop exit
PB: predicated region body
PF: predicated region fallthrough
CT: control target
= control target key end

     0   :  { %8 = vsyncpa [#allocation3], 0  ;;  %s176_s0 = inlined_call_operand.vmem [shape: f32[2,32], index: 0, kind: input, shape index: {}]   ;;  %s177_s1 = inlined_call_operand.hbm [shape: f32[2,32], index: 1, kind: input, shape index: {}]   ;;  %s178_s2 = inlined_call_operand.vmem [shape: f32[2,1], index: 2, kind: input, shape index: {}]   ;;  %s179_s3 = inlined_call_operand.hbm [shape: f32[2,2], index: 3, kind: output, shape index: {}]  }
   0x1   :  { %9 = vsyncpa [#allocation4], 0  ;;  %s17_s14 = sshll.u32 %s177_s1, 4  ;;  %s141_s15 = smov [#allocation2]   ;;  %s18_s14 = int_to_ptr.hbm [resolvable:$true] %s17_s14 }
   0x2   :  { %s19_s16 = sshll.u32 %s141_s15, 4  ;;  %s20_s16 = int_to_ptr.vmem [resolvable:$true] %s19_s16 }
   0x3   :  { %22 = dma.hbm_to_vmem [thread:$0]  %s18_s14, 32, %s20_s16, [#allocation3]  }
   0x4   :  { %137 = dma.done.wait [#allocation3], 32  }
   0x5   :  { %138 = vsyncadd [#allocation3], 4294967264  ;;  %v142_v0 = vmov 0   ;;  %vm37_vm0 = vcmask 261120   ;;  %v30_v1 = vld [vmem:[%s176_s0] sm:$0x3] }
   0x6   :  { %88 = vset.pattern.permute.xlu0 %v142_v0  ;;  %v31_v2 = vld [vmem:[%s178_s2] sm:$0x3]  ;;  %83 = vmatpush.xpose.msk.msra.mxu0 %vm37_vm0, %v30_v1  ;;  %s143_s1 = smov [#allocation5]   ;;  %s73_s24 = sshll.u32 %s179_s3, 4  ;;  %vm64_vm1 = vcmask 9216   ;;  %s74_s24 = int_to_ptr.hbm [resolvable:$true] %s73_s24 }
   0x7   :  { %v29_v3 = vld [vmem:[#allocation2] sm:$0x3]  ;;  %34 = vperm.xlu0 %88, %v31_v2   ;;  %s71_s21 = sshll.u32 %s143_s1, 4  ;;  %s72_s21 = int_to_ptr.vmem [resolvable:$true] %s71_s21 }
   0x9   :  { %84 = vmatmul.msk.f32.vlgmr.msra.gmra.mxu0 %vm37_vm0, %v29_v3 }
  0x79   :  { %v35_v4 = vpop.permute.xlu0 %34 }
  0x86   :  { %v61_v5 = vpop.f32.mrf.mxu0 }
  0x87   :  { %v62_v6 = vadd.f32 %v61_v5, %v35_v4 }
  0x89   :  { %65 = vst.msk [vmem:[#allocation5] sm:$0x3] %vm64_vm1, %v62_v6 }
  0x8a   :  { %76 = dma.vmem_to_hbm [thread:$0]  %s72_s21, 32, %s74_s24, [#allocation4]  }
  0x8b   :  { %139 = dma.done.wait [#allocation4], 32  }
  0x8c   :  { %140 = vsyncadd [#allocation4], 4294967264 }
  0x8d   :  { %81 = vsyncpa [#allocation3], 1 }
  0x8e   :  { %82 = vsyncpa [#allocation4], 1 }

</bundles_post_ra>
